<compile_context>
chip_gen: v7x
topology: tpu7x:2x2x1
jax: 0.10.0
libtpu: 0.0.40
codegen_flags: <defaults>
</compile_context>

<pallas_src>
import math

import jax
import jax.numpy as jnp
from jax import lax
from jax.experimental import pallas as pl
from jax.experimental.pallas import tpu as pltpu


# ---------------------------------------------------------------------------
# Fast path: whole table resident in VMEM, gather via one-hot MXU matmul.
# ---------------------------------------------------------------------------
def _vmem_onehot_kernel(ids_ref, table_ref, out_ref):
    # ids_ref:   VMEM (tn, 1) int32  -- token ids of this tile
    # table_ref: VMEM (V, E_pad)     -- full table; constant block index, so
    #                                   it is DMA'd once and stays resident
    # out_ref:   VMEM (tn, E_pad)
    tn = out_ref.shape[0]
    v = table_ref.shape[0]
    ids = ids_ref[...]                                          # (tn, 1)
    onehot = (ids == lax.broadcasted_iota(jnp.int32, (tn, v), 1)).astype(
        table_ref.dtype)
    # Exact gather: exactly one 1.0 per row, everything else contributes 0.
    out_ref[...] = jnp.dot(
        onehot, table_ref[...], preferred_element_type=jnp.float32
    ).astype(out_ref.dtype)


# ---------------------------------------------------------------------------
# Large-table path: HBM row gather DMA'd straight into the output tile.
# ---------------------------------------------------------------------------
def _hbm_gather_kernel(ids_ref, table_hbm, out_ref, copy_sem):
    # ids_ref:   SMEM (n_pad,) int32 -- all flattened token ids (scalar prefetch)
    # table_hbm: HBM  (V, E_pad)     -- full table, never copied wholesale
    # out_ref:   VMEM (tn, E_pad)    -- output tile; gathered rows land here
    # copy_sem:  single DMA semaphore shared by all row copies of this tile
    tile = pl.program_id(0)
    tn = out_ref.shape[0]
    base = tile * tn

    # Issue all tn row copies back-to-back so they are in flight concurrently;
    # destination is the output tile itself (no staging buffer, no extra copy).
    @pl.loop(0, tn)
    def _issue(t):
        row = ids_ref[base + t]
        pltpu.make_async_copy(
            table_hbm.at[pl.ds(row, 1), :],
            out_ref.at[pl.ds(t, 1), :],
            copy_sem,
        ).start()

    # Single aggregated wait: every row copy signals `copy_sem`, so one wait
    # whose byte count equals the whole (tn, E_pad) destination covers them
    # all.  The descriptor below is only used for its byte count (never
    # started); using out_ref for src and dst keeps it shape-correct for any
    # vocab size.
    pltpu.make_async_copy(out_ref, out_ref, copy_sem).wait()


# ---------------------------------------------------------------------------
# Wrapper / dispatch.
# ---------------------------------------------------------------------------
_FAST_PATH_MAX_VOCAB = 2048              # keep the O(V) one-hot work tiny
_FAST_PATH_MAX_TABLE_BYTES = 4 << 20     # fits scoped VMEM on v5e/v6e/v7x


def embedding_lookup(ids, table, *, tn=None, force_path=None):
    """Pallas equivalent of nn.Embedding(vocab_size, embed_size)(ids)."""
    orig_shape = ids.shape
    V, E = table.shape
    N = int(math.prod(orig_shape)) if orig_shape else 1
    itemsize = jnp.dtype(table.dtype).itemsize

    # Pad the embedding dim to a multiple of 128 lanes so output stores / DMAs
    # are unmasked (lane-dense); sliced back after the call.
    E_pad = pl.cdiv(E, 128) * 128
    if E_pad != E:
        table = jnp.pad(table, ((0, 0), (0, E_pad - E)))

    if tn is None:
        tn = min(128, N)                  # up to 128 tokens per grid step
    n_pad = pl.cdiv(N, tn) * tn

    ids_flat = ids.reshape(N).astype(jnp.int32)
    # Clamp so the gather can never read out of bounds (see TODO above).
    ids_flat = jnp.clip(ids_flat, 0, V - 1)
    if n_pad != N:
        ids_flat = jnp.pad(ids_flat, (0, n_pad - N))

    table_bytes = V * E_pad * itemsize
    fast_path = (V <= _FAST_PATH_MAX_VOCAB
                 and table_bytes <= _FAST_PATH_MAX_TABLE_BYTES)
    if force_path == "vmem":
        fast_path = True
    elif force_path == "hbm":
        fast_path = False

    if fast_path:
        cost = pl.CostEstimate(
            flops=2 * n_pad * V * E_pad,
            transcendentals=0,
            bytes_accessed=int(table_bytes + n_pad * E_pad * itemsize + n_pad * 4),
        )
        out_flat = pl.pallas_call(
            _vmem_onehot_kernel,
            out_shape=jax.ShapeDtypeStruct((n_pad, E_pad), table.dtype),
            grid_spec=pltpu.PrefetchScalarGridSpec(
                num_scalar_prefetch=0,
                grid=(n_pad // tn,),
                in_specs=[
                    pl.BlockSpec((tn, 1), lambda i: (i, 0)),     # ids tile
                    pl.BlockSpec((V, E_pad), lambda i: (0, 0)),  # resident table
                ],
                out_specs=pl.BlockSpec((tn, E_pad), lambda i: (i, 0)),
            ),
            compiler_params=pltpu.CompilerParams(
                dimension_semantics=("parallel",),
            ),
            cost_estimate=cost,
        )(ids_flat.reshape(n_pad, 1), table)
    else:
        # TODO(synk): scalar-prefetched ids live whole in SMEM (pads to
        #             next_pow2(4*n_pad) bytes); for very large token counts a
        #             blocked SMEM in_spec for the ids would bound SMEM usage.
        cost = pl.CostEstimate(
            flops=0,
            transcendentals=0,
            bytes_accessed=int(2 * n_pad * E_pad * itemsize + n_pad * 4),
        )
        out_flat = pl.pallas_call(
            _hbm_gather_kernel,
            out_shape=jax.ShapeDtypeStruct((n_pad, E_pad), table.dtype),
            grid_spec=pltpu.PrefetchScalarGridSpec(
                num_scalar_prefetch=1,                          # ids -> SMEM
                grid=(n_pad // tn,),
                in_specs=[pl.BlockSpec(memory_space=pl.ANY)],   # table in HBM
                out_specs=pl.BlockSpec((tn, E_pad), lambda i, ids: (i, 0)),
                scratch_shapes=[
                    pltpu.SemaphoreType.DMA(()),                # shared DMA sem
                ],
            ),
            compiler_params=pltpu.CompilerParams(
                dimension_semantics=("parallel",),              # v7x: 2 TCs
            ),
            cost_estimate=cost,
        )(ids_flat, table)

    out = out_flat[:N, :E]
    return out.reshape(*orig_shape, E)


if __name__ == "__main__":
    # Module hyper-parameters (small, consistent with EmbeddingLayer.__init__).
    vocab_size = 256
    embed_size = 128
    batch, seq = 2, 8

    key = jax.random.PRNGKey(0)
    k_table, k_ids = jax.random.split(key)

    # nn.Embedding default init: weight ~ N(0, 1).
    table = jax.random.normal(k_table, (vocab_size, embed_size), dtype=jnp.float32)
    ids = jax.random.randint(k_ids, (batch, seq), 0, vocab_size, dtype=jnp.int32)

    # Reference: plain gather (what torch's nn.Embedding does).
    ref = jnp.take(table, ids, axis=0)

    # Fast path (table fits VMEM -> one-hot MXU gather).
    out = embedding_lookup(ids, table)
    out = jax.block_until_ready(out)
    assert out.shape == (batch, seq, embed_size)
    assert out.dtype == jnp.float32
    assert jnp.array_equal(out, ref), "fast path mismatch vs reference gather"

    # Large-table path (HBM row-DMA gather), forced so both paths are checked.
    out_hbm = embedding_lookup(ids, table, force_path="hbm")
    out_hbm = jax.block_until_ready(out_hbm)
    assert jnp.array_equal(out_hbm, ref), "hbm path mismatch vs reference gather"

    print("KERNEL_OK")
</pallas_src>

<mosaic_0001>
module attributes {stable_mosaic.version = 11 : i64} {
  func.func @_vmem_onehot_kernel(%arg0: i32, %arg1: memref<16x1xi32, #tpu.memory_space<vmem>>, %arg2: memref<256x128xf32, #tpu.memory_space<vmem>>, %arg3: memref<16x128xf32, #tpu.memory_space<vmem>>) attributes {dimension_semantics = [#tpu.dimension_semantics<parallel>], iteration_bounds = array<i64: 1>, scalar_prefetch = 0 : i64, scratch_operands = 0 : i64, tpu.core_type = #tpu.core_type<tc>, window_params = [{transform_indices = @transform_0, window_bounds = array<i64: 16, 1>}, {pipeline_mode = #tpu.pipeline_mode<synchronous>, transform_indices = @transform_1, window_bounds = array<i64: 256, 128>}, {transform_indices = @transform_2, window_bounds = array<i64: 16, 128>}]} {
    %c0 = arith.constant 0 : index
    %c0_0 = arith.constant 0 : index
    %0 = vector.load %arg1[%c0, %c0_0] : memref<16x1xi32, #tpu.memory_space<vmem>>, vector<16x1xi32>
    %1 = tpu.iota {dimensions = array<i32: 1>} : vector<16x256xi32>
    %2 = vector.broadcast %0 : vector<16x1xi32> to vector<16x256xi32>
    %3 = arith.cmpi eq, %2, %1 : vector<16x256xi32>
    %4 = arith.extui %3 : vector<16x256xi1> to vector<16x256xi32>
    %5 = arith.sitofp %4 : vector<16x256xi32> to vector<16x256xf32>
    %c0_1 = arith.constant 0 : index
    %c0_2 = arith.constant 0 : index
    %6 = vector.load %arg2[%c0_1, %c0_2] : memref<256x128xf32, #tpu.memory_space<vmem>>, vector<256x128xf32>
    %cst = arith.constant dense<0.000000e+00> : vector<16x128xf32>
    %7 = tpu.matmul %5, %6, %cst {dimension_numbers = #tpu.dot_dimension_numbers<[1], [0], [0], [1], [0, 0, 1, 1], [], []>} : vector<16x256xf32>, vector<256x128xf32>, vector<16x128xf32> -> vector<16x128xf32>
    %c0_3 = arith.constant 0 : index
    %c0_4 = arith.constant 0 : index
    %8 = vector.load %arg3[%c0_3, %c0_4] : memref<16x128xf32, #tpu.memory_space<vmem>>, vector<16x128xf32>
    tpu.vector_store %arg3[%c0_3, %c0_4], %7 {strides = array<i32>} : memref<16x128xf32, #tpu.memory_space<vmem>>, vector<16x128xf32>,
    return
  }
  func.func @transform_0(%arg0: i32) -> (i32, i32) {
    %c0_i32 = arith.constant 0 : i32
    %c0_i32_0 = arith.constant 0 : i32
    return %arg0, %c0_i32 : i32, i32
  }
  func.func @transform_1(%arg0: i32) -> (i32, i32) {
    %c0_i32 = arith.constant 0 : i32
    %c0_i32_0 = arith.constant 0 : i32
    %c0_i32_1 = arith.constant 0 : i32
    return %c0_i32, %c0_i32_0 : i32, i32
  }
  func.func @transform_2(%arg0: i32) -> (i32, i32) {
    %c0_i32 = arith.constant 0 : i32
    %c0_i32_0 = arith.constant 0 : i32
    return %arg0, %c0_i32 : i32, i32
  }
}

</mosaic_0001>

<bundles_post_ra>
// kernel: tpu_custom_call.1
= control target key start
LH: loop header
LB: loop body
LE: loop exit
PB: predicated region body
PF: predicated region fallthrough
CT: control target
= control target key end

     0   :  { %7 = vsyncpa [#allocation3], 0  ;;  %s381_s0 = inlined_call_operand.vmem [shape: s32[16,1], index: 0, kind: input, shape index: {}]   ;;  %s382_s1 = inlined_call_operand.hbm [shape: f32[256,128], index: 1, kind: input, shape index: {}]   ;;  %s383_s2 = inlined_call_operand.hbm [shape: f32[16,128], index: 2, kind: output, shape index: {}]  }
   0x1   :  { %8 = vsyncpa [#allocation4], 0  ;;  %s324_s9 = smov [#allocation2]   ;;  %s276_s13 = scalar_lea.hbm %s382_s1, 4096 }
   0x2   :  { %s16_s10 = sshll.u32 %s324_s9, 4  ;;  %p277_p0 = scmp.ne.s32.totalorder %s382_s1, %s276_s13  ;;  %s17_s10 = int_to_ptr.vmem [resolvable:$true] %s16_s10 }
   0x3   :  { %p280_p1 = scmp.lt.u32.totalorder %s276_s13, %s382_s1 }
   0x5   :  { %p282_p2 = pnand %p280_p1, %p277_p0 }
   0x7   :  { %285 = shalt.err (!%p282_p2)
}
   0x8   :  { %s286_s18 = scalar_lea.vmem %s17_s10, 4096  ;;  %p291_p4 = scmp.lt.s32.totalorder %s17_s10, %s17_s10 }
   0x9   :  { %p287_p3 = scmp.ne.s32.totalorder %s17_s10, %s286_s18  ;;  %p292_p5 = scmp.lt.s32.totalorder %s286_s18, %s286_s18 }
   0xb   :  { %p293_p6 = por %p292_p5, %p291_p4 }
   0xd   :  { %p294_p7 = pnand %p293_p6, %p287_p3 }
   0xf   :  { %297 = shalt.err (!%p294_p7)
}
  0x10   :  { %s325_s19 = smov 128   ;;  %s326_s20 = smov 8  }
  0x11   :  { %22 = dma.hbm_to_vmem [thread:$0]  %s382_s1, 4096, %s17_s10, [#allocation3], %s325_s19, %s325_s19, %s326_s20  }
  0x12   :  { %320 = dma.done.wait [#allocation3], 4096  }
  0x13   :  { %321 = vsyncadd [#allocation3], 4294963200  ;;  %v327_v0 = vmov 0   ;;  %v26_v1 = vld [vmem:[%s381_s0] sm:$0xff]  ;;  %v27_v2 = vld [vmem:[%s381_s0 + $0x8] sm:$0xff]  ;;  %v28_v51 = vlaneseq  ;;  %v328_v55 = vmov 1.0  }
  0x14   :  { %275 = vset.pattern.permute.xlu0 %v327_v0  ;;  %v65_v3 = vld [vmem:[#allocation2 + $0x80] sm:$0xff]  ;;  %v66_v4 = vld [vmem:[#allocation2 + $0x88] sm:$0xff]  ;;  %v67_v9 = vld [vmem:[#allocation2 + $0x90] sm:$0xff]  ;;  %s329_s0 = smov [#allocation5]  }
  0x15   :  { %32 = vperm.xlu0 %275, %v26_v1   ;;  %v49_v5 = vld [vmem:[#allocation2] sm:$0xff]  ;;  %v50_v6 = vld [vmem:[#allocation2 + $0x8] sm:$0xff]  ;;  %v221_v7 = vpack.c.bf16 %v66_v4, %v65_v3  ;;  %v68_v10 = vld [vmem:[#allocation2 + $0x98] sm:$0xff]  ;;  %v29_v52 = vand.u32 127, %v28_v51  ;;  %s163_s1 = sshll.u32 %s329_s0, 4  ;;  %s164_s1 = int_to_ptr.vmem [resolvable:$true] %s163_s1 }
  0x16   :  { %v223_v8 = vpack.c.bf16 %v50_v6, %v49_v5  ;;  %v51_v11 = vld [vmem:[#allocation2 + $0x10] sm:$0xff]  ;;  %v225_v12 = vpack.c.bf16 %v68_v10, %v67_v9  ;;  %v52_v13 = vld [vmem:[#allocation2 + $0x18] sm:$0xff]  ;;  %v69_v14 = vld [vmem:[#allocation2 + $0xa0] sm:$0xff]  ;;  %s298_s27 = scalar_lea.vmem %s164_s1, 256  ;;  %p303_p9 = scmp.lt.s32.totalorder %s164_s1, %s164_s1 }
  0x17   :  { %v70_v15 = vld [vmem:[#allocation2 + $0xa8] sm:$0xff]  ;;  %222 = vmatprep.subr.bf16.mxu0 %v221_v7  ;;  %253 = vmatprep.subr.bf16.mxu1 %v221_v7  ;;  %v227_v16 = vpack.c.bf16 %v52_v13, %v51_v11  ;;  %v53_v18 = vld [vmem:[#allocation2 + $0x20] sm:$0xff]  ;;  %v71_v20 = vld [vmem:[#allocation2 + $0xb0] sm:$0xff]  ;;  %v30_v53 = vadd.s32 128, %v29_v52  ;;  %p299_p8 = scmp.ne.s32.totalorder %s164_s1, %s298_s27  ;;  %p304_p10 = scmp.lt.s32.totalorder %s298_s27, %s298_s27 }
  0x18   :  { %224 = vmatpush3.bf16.msra.mxu0 %v223_v8  ;;  %261 = vmatpush3.bf16.msra.mxu1 %v223_v8  ;;  %v229_v17 = vpack.c.bf16 %v70_v15, %v69_v14  ;;  %v54_v19 = vld [vmem:[#allocation2 + $0x28] sm:$0xff]  ;;  %v72_v21 = vld [vmem:[#allocation2 + $0xb8] sm:$0xff]  ;;  %v55_v24 = vld [vmem:[#allocation2 + $0x30] sm:$0xff] }
  0x19   :  { %35 = vperm.xlu0 %275, %v27_v2   ;;  %226 = vmatprep.subr.bf16.mxu0 %v225_v12  ;;  %v231_v22 = vpack.c.bf16 %v54_v19, %v53_v18  ;;  %v233_v23 = vpack.c.bf16 %v72_v21, %v71_v20  ;;  %v56_v25 = vld [vmem:[#allocation2 + $0x38] sm:$0xff]  ;;  %v73_v26 = vld [vmem:[#allocation2 + $0xc0] sm:$0xff]  ;;  %v74_v27 = vld [vmem:[#allocation2 + $0xc8] sm:$0xff]  ;;  %p305_p11 = por %p304_p10, %p303_p9 }
  0x1a   :  { %254 = vmatprep.subr.bf16.mxu1 %v225_v12  ;;  %v235_v28 = vpack.c.bf16 %v56_v25, %v55_v24  ;;  %v237_v29 = vpack.c.bf16 %v74_v27, %v73_v26  ;;  %v57_v30 = vld [vmem:[#allocation2 + $0x40] sm:$0xff]  ;;  %v58_v31 = vld [vmem:[#allocation2 + $0x48] sm:$0xff]  ;;  %v75_v32 = vld [vmem:[#allocation2 + $0xd0] sm:$0xff] }
  0x1b   :  { %v76_v33 = vld [vmem:[#allocation2 + $0xd8] sm:$0xff]  ;;  %v239_v34 = vpack.c.bf16 %v58_v31, %v57_v30  ;;  %v59_v36 = vld [vmem:[#allocation2 + $0x50] sm:$0xff]  ;;  %v77_v38 = vld [vmem:[#allocation2 + $0xe0] sm:$0xff]  ;;  %p306_p12 = pnand %p305_p11, %p299_p8 }
  0x1c   :  { %228 = vmatpush3.bf16.msra.mxu0 %v227_v16  ;;  %262 = vmatpush3.bf16.msra.mxu1 %v227_v16  ;;  %v241_v35 = vpack.c.bf16 %v76_v33, %v75_v32  ;;  %v60_v37 = vld [vmem:[#allocation2 + $0x58] sm:$0xff]  ;;  %v78_v39 = vld [vmem:[#allocation2 + $0xe8] sm:$0xff]  ;;  %v61_v42 = vld [vmem:[#allocation2 + $0x60] sm:$0xff] }
  0x1d   :  { %230 = vmatprep.subr.bf16.mxu0 %v229_v17  ;;  %255 = vmatprep.subr.bf16.mxu1 %v229_v17  ;;  %v243_v40 = vpack.c.bf16 %v60_v37, %v59_v36  ;;  %v245_v41 = vpack.c.bf16 %v78_v39, %v77_v38  ;;  %v62_v43 = vld [vmem:[#allocation2 + $0x68] sm:$0xff]  ;;  %v79_v44 = vld [vmem:[#allocation2 + $0xf0] sm:$0xff]  ;;  %v80_v45 = vld [vmem:[#allocation2 + $0xf8] sm:$0xff] }
  0x1e   :  { %v247_v46 = vpack.c.bf16 %v62_v43, %v61_v42  ;;  %v249_v47 = vpack.c.bf16 %v80_v45, %v79_v44  ;;  %v63_v48 = vld [vmem:[#allocation2 + $0x70] sm:$0xff]  ;;  %v64_v49 = vld [vmem:[#allocation2 + $0x78] sm:$0xff] }
  0x1f   :  { %v251_v50 = vpack.c.bf16 %v64_v49, %v63_v48 }
  0x20   :  { %232 = vmatpush3.bf16.msra.mxu0 %v231_v22  ;;  %263 = vmatpush3.bf16.msra.mxu1 %v231_v22 }
  0x21   :  { %234 = vmatprep.subr.bf16.mxu0 %v233_v23  ;;  %256 = vmatprep.subr.bf16.mxu1 %v233_v23 }
  0x24   :  { %236 = vmatpush3.bf16.msra.mxu0 %v235_v28  ;;  %264 = vmatpush3.bf16.msra.mxu1 %v235_v28 }
  0x25   :  { %238 = vmatprep.subr.bf16.mxu0 %v237_v29  ;;  %257 = vmatprep.subr.bf16.mxu1 %v237_v29 }
  0x28   :  { %240 = vmatpush3.bf16.msra.mxu0 %v239_v34  ;;  %265 = vmatpush3.bf16.msra.mxu1 %v239_v34 }
  0x29   :  { %242 = vmatprep.subr.bf16.mxu0 %v241_v35  ;;  %258 = vmatprep.subr.bf16.mxu1 %v241_v35 }
  0x2c   :  { %244 = vmatpush3.bf16.msra.mxu0 %v243_v40  ;;  %266 = vmatpush3.bf16.msra.mxu1 %v243_v40 }
  0x2d   :  { %246 = vmatprep.subr.bf16.mxu0 %v245_v41  ;;  %259 = vmatprep.subr.bf16.mxu1 %v245_v41 }
  0x30   :  { %248 = vmatpush3.bf16.msra.mxu0 %v247_v46  ;;  %267 = vmatpush3.bf16.msra.mxu1 %v247_v46 }
  0x31   :  { %250 = vmatprep.subr.bf16.mxu0 %v249_v47  ;;  %260 = vmatprep.subr.bf16.mxu1 %v249_v47 }
  0x34   :  { %252 = vmatpush3.bf16.msra.mxu0 %v251_v50  ;;  %268 = vmatpush3.bf16.msra.mxu1 %v251_v50 }
  0x94   :  { %v33_v54 = vpop.permute.xlu0 %32 }
  0x95   :  { %vm37_vm0 = vcmp.eq.s32.totalorder %v33_v54, %v29_v52  ;;  %vm38_vm1 = vcmp.eq.s32.totalorder %v33_v54, %v30_v53 }
  0x96   :  { %179 = vmatprep.mubr.msk.f32.mxu0 %vm38_vm1, %v328_v55 }
  0x97   :  { %180 = vmatmul.mubr.msk.f32.vlgmr.msra.gmra.mrb[0].mxu0 %vm37_vm0, %v328_v55 }
  0x98   :  { %v36_v56 = vpop.permute.xlu0 %35 }
  0x99   :  { %vm39_vm2 = vcmp.eq.s32.totalorder %v36_v56, %v29_v52  ;;  %vm40_vm3 = vcmp.eq.s32.totalorder %v36_v56, %v30_v53 }
  0x9a   :  { %181 = vmatprep.mubr.msk.f32.mxu1 %vm40_vm3, %v328_v55 }
  0x9b   :  { %182 = vmatmul.mubr.msk.f32.vlgmr.msra.gmra.mrb[0].mxu1 %vm39_vm2, %v328_v55 }
 0x16a   :  { %v215_v57 = vpop.f32.mrb[0].mxu0 }
 0x16b   :  { %v216_v58 = vpop.f32.mrb[1].mxu0 }
 0x16c   :  { %v217_v59 = vadd.f32 %v216_v58, %v215_v57 }
 0x16e   :  { %156 = vst [vmem:[#allocation5] sm:$0xff] %v217_v59  ;;  %v218_v60 = vpop.f32.mrb[0].mxu1 }
 0x16f   :  { %v219_v61 = vpop.f32.mrb[1].mxu1 }
 0x170   :  { %v220_v62 = vadd.f32 %v219_v61, %v218_v60 }
 0x172   :  { %157 = vst [vmem:[#allocation5 + $0x8] sm:$0xff] %v220_v62 }
 0x173   :  { %309 = shalt.err (!%p306_p12)
}
 0x174   :  { %s310_s30 = scalar_lea.hbm %s383_s2, 256 }
 0x175   :  { %p311_p13 = scmp.ne.s32.totalorder %s383_s2, %s310_s30  ;;  %p314_p0 = scmp.lt.u32.totalorder %s310_s30, %s383_s2 }
 0x177   :  { %p316_p1 = pnand %p314_p0, %p311_p13 }
 0x179   :  { %319 = shalt.err (!%p316_p1)
}
 0x17a   :  { %169 = dma.vmem_to_hbm [thread:$0]  %s164_s1, 256, %s383_s2, [#allocation4], %s325_s19, %s325_s19, %s326_s20  }
 0x17b   :  { %322 = dma.done.wait [#allocation4], 256  }
 0x17c   :  { %323 = vsyncadd [#allocation4], 4294967040 }
 0x17d   :  { %173 = vsyncpa [#allocation3], 1 }
 0x17e   :  { %174 = vsyncpa [#allocation4], 1 }

</bundles_post_ra>
